<compile_context>
chip_gen: v7x
topology: tpu7x:2x2x1
jax: 0.10.0
libtpu: 0.0.40
codegen_flags: <defaults>
</compile_context>

<pallas_src>
import functools

import numpy as np
import jax
import jax.numpy as jnp
from jax.experimental import pallas as pl
from jax.experimental.pallas import tpu as pltpu

BN_EPS = 1e-3        # matches nn.BatchNorm1d(eps=0.001)
MAX_TILE_L = 512     # lanes per grid step (v6e can afford 1024; keep 512 for v7x)


def _round_up(x, m):
    return (x + m - 1) // m * m


def _conv_tile(x_ref, w_ref, lt, *, k_taps, stride, c_in_p, tile_l, single_tile):
    """One fused conv matmul for the current (sample, L-tile).

    x_ref: (1, stride*c_in_p, L_q) phase-de-interleaved resident input row.
    w_ref: (C_out, K*c_in_p) flattened weights (tap-major, channel-minor).
    Returns (C_out, tile_l) f32 with L on lanes.
    """
    if single_tile:
        base = 0                                   # fully static slices
    else:
        base = pl.multiple_of(lt * tile_l, 128)    # tile_l is a multiple of 128
    parts = []
    for kk in range(k_taps):                       # static unrolled tap loop
        row0 = (kk % stride) * c_in_p              # static, sublane-tile aligned
        col0 = base + (kk // stride)
        parts.append(x_ref[0, pl.ds(row0, c_in_p), pl.ds(col0, tile_l)])
    stacked = parts[0] if k_taps == 1 else jnp.concatenate(parts, axis=0)
    # (C_out, K*c_in_p) . (K*c_in_p, tile_l) -> (C_out, tile_l), single MXU matmul.
    return jax.lax.dot_general(
        w_ref[...], stacked,
        dimension_numbers=(((1,), (0,)), ((), ())),
        preferred_element_type=jnp.float32)


def _stats_kernel(x_ref, w_ref, stats_ref, acc_ref, *,
                  k_taps, stride, c_in_p, tile_l, l_out, needs_mask, single_tile):
    """Pass 1: per-(sample, channel) sum / sum-of-squares of the conv output."""
    lt = pl.program_id(1)

    @pl.when(lt == 0)
    def _():
        acc_ref[...] = jnp.zeros_like(acc_ref)

    y = _conv_tile(x_ref, w_ref, lt, k_taps=k_taps, stride=stride,
                   c_in_p=c_in_p, tile_l=tile_l, single_tile=single_tile)
    if needs_mask:   # only compiled in when l_out_p != l_out
        lane = jax.lax.broadcasted_iota(jnp.int32, y.shape, 1)
        y = jnp.where(lane + lt * tile_l < l_out, y, 0.0)

    acc_ref[0] += y          # lane-wise partials (VPU); cross-lane reduce deferred
    acc_ref[1] += y * y

    @pl.when(lt == pl.num_programs(1) - 1)
    def _():
        stats_ref[...] = jnp.sum(acc_ref[...], axis=-1)[None]   # (1, 2, C_out)


def _norm_kernel(x_ref, w_ref, shift_ref, o_ref, *,
                 k_taps, stride, c_in_p, tile_l, use_relu, single_tile):
    """Pass 2: conv with BN-scale-folded weights, + shift (+ ReLU), stored NCL."""
    lt = pl.program_id(1)
    y = _conv_tile(x_ref, w_ref, lt, k_taps=k_taps, stride=stride,
                   c_in_p=c_in_p, tile_l=tile_l, single_tile=single_tile)
    out = y + shift_ref[...]                 # (C_out, 1) broadcast over lanes
    if use_relu:
        out = jnp.maximum(out, 0.0)
    o_ref[0] = out.astype(o_ref.dtype)


def batchnorm_conv1d(x, weight, gamma, beta, *, stride, padding, use_relu,
                     mxu_dtype=jnp.float32):
    """x: (N, C_in, L); weight: (C_out, C_in, K); gamma/beta: (C_out,). Returns NCL."""
    n, c_in, length = x.shape
    c_out, c_in_w, k = weight.shape
    assert c_in_w == c_in and stride >= 1 and k >= 1 and padding >= 0

    l_conv_in = length + 2 * padding
    l_out = (l_conv_in - k) // stride + 1
    assert l_out >= 1

    itemsize = np.dtype(mxu_dtype).itemsize
    sublane = 8 * 4 // itemsize                      # f32: 8, bf16: 16
    c_in_p = _round_up(c_in, sublane)                # keeps the in-kernel concat aligned

    # L tiling (output lanes). tile_l is always a multiple of 128.
    if _round_up(l_out, 128) <= MAX_TILE_L:
        tile_l = l_out_p = _round_up(l_out, 128)
    else:
        tile_l = MAX_TILE_L
        l_out_p = _round_up(l_out, tile_l)
    num_lt = l_out_p // tile_l
    single_tile = num_lt == 1
    needs_mask = l_out_p != l_out

    # Phase-de-interleaved input length so every tap/tile read is in bounds.
    l_q = max(l_out_p + (k - 1) // stride, -(-l_conv_in // stride))
    l_in_p = l_q * stride

    # ---- layout plumbing (plain JAX, input-sized only; no K-fold expansion) ----
    # x_ph[n, p*c_in_p + c, q] = x_padded[n, c, q*stride + p]
    x_p = jnp.pad(x, ((0, 0), (0, c_in_p - c_in),
                      (padding, l_in_p - length - padding)))
    x_ph = x_p.reshape(n, c_in_p, l_q, stride)
    x_ph = jnp.transpose(x_ph, (0, 3, 1, 2)).reshape(n, stride * c_in_p, l_q)
    x_ph = x_ph.astype(mxu_dtype)

    # w_flat[o, kk*c_in_p + c] = weight[o, c, kk]  (f32 master copy)
    w_pad = jnp.pad(weight.astype(jnp.float32),
                    ((0, 0), (0, c_in_p - c_in), (0, 0)))
    w_flat = jnp.transpose(w_pad, (0, 2, 1)).reshape(c_out, k * c_in_p)
    w1 = w_flat.astype(mxu_dtype)

    # VMEM budget: resident row + weights (double-buffered) + tiles + scratch.
    est = (2 * stride * c_in_p * l_q * itemsize
           + 4 * c_out * k * c_in_p * itemsize
           + 2 * c_out * tile_l * 4          # pass-2 out tile
           + 2 * c_out * tile_l * 4          # pass-1 acc scratch
           + (2 << 20))
    vmem_bytes = int(min(100 * 2**20, max(32 * 2**20, est)))

    x_row_spec = pl.BlockSpec((1, stride * c_in_p, l_q), lambda b, lt: (b, 0, 0))
    w_spec = pl.BlockSpec((c_out, k * c_in_p), lambda b, lt: (0, 0))

    # ---- pass 1: conv + per-sample channel sums / sums of squares ----
    stats_kernel = functools.partial(
        _stats_kernel, k_taps=k, stride=stride, c_in_p=c_in_p, tile_l=tile_l,
        l_out=l_out, needs_mask=needs_mask, single_tile=single_tile)
    stats = pl.pallas_call(
        stats_kernel,
        out_shape=jax.ShapeDtypeStruct((n, 2, c_out), jnp.float32),
        grid_spec=pltpu.PrefetchScalarGridSpec(
            num_scalar_prefetch=0,
            grid=(n, num_lt),
            in_specs=[x_row_spec, w_spec],
            out_specs=pl.BlockSpec((1, 2, c_out), lambda b, lt: (b, 0, 0)),
            scratch_shapes=[pltpu.VMEM((2, c_out, tile_l), jnp.float32)],
        ),
        compiler_params=pltpu.CompilerParams(
            dimension_semantics=("parallel", "arbitrary"),
            vmem_limit_bytes=vmem_bytes),
    )(x_ph, w1)

    # ---- finalize BN statistics (tiny (C_out,)-sized work, f32) ----
    m_total = jnp.float32(n * l_out)
    g = gamma.astype(jnp.float32)
    b_ = beta.astype(jnp.float32)
    ch_sum = jnp.sum(stats[:, 0, :], axis=0)
    ch_sq = jnp.sum(stats[:, 1, :], axis=0)
    mean = ch_sum / m_total
    var = jnp.maximum(ch_sq / m_total - mean * mean, 0.0)
    inv_std = jax.lax.rsqrt(var + BN_EPS)
    scale = g * inv_std                                          # (C_out,)
    shift = (b_ - mean * scale).reshape(c_out, 1)
    # Fold the BN scale into the pass-2 weights (weight-sized wrapper work).
    w2 = (w_flat * scale[:, None]).astype(mxu_dtype)

    # ---- pass 2: conv(scaled W) + shift + activation, written directly as NCL ----
    norm_kernel = functools.partial(
        _norm_kernel, k_taps=k, stride=stride, c_in_p=c_in_p, tile_l=tile_l,
        use_relu=use_relu, single_tile=single_tile)
    out = pl.pallas_call(
        norm_kernel,
        out_shape=jax.ShapeDtypeStruct((n, c_out, l_out_p), jnp.float32),
        grid_spec=pltpu.PrefetchScalarGridSpec(
            num_scalar_prefetch=0,
            grid=(n, num_lt),
            in_specs=[
                x_row_spec,
                w_spec,
                pl.BlockSpec((c_out, 1), lambda b, lt: (0, 0)),   # resident shift
            ],
            out_specs=pl.BlockSpec((1, c_out, tile_l), lambda b, lt: (b, 0, lt)),
        ),
        compiler_params=pltpu.CompilerParams(
            dimension_semantics=("parallel", "parallel"),
            vmem_limit_bytes=vmem_bytes),
    )(x_ph, w2, shift)

    if l_out_p != l_out:
        out = out[:, :, :l_out]
    return out


def _reference(x, weight, gamma, beta, *, stride, padding, use_relu):
    """Pure-JAX reference matching PyTorch semantics (training-mode BN, biased var)."""
    y = jax.lax.conv_general_dilated(
        x, weight,
        window_strides=(stride,),
        padding=[(padding, padding)],
        dimension_numbers=("NCH", "OIH", "NCH"),
    )
    mean = jnp.mean(y, axis=(0, 2), keepdims=True)
    var = jnp.mean((y - mean) ** 2, axis=(0, 2), keepdims=True)
    y = (y - mean) / jnp.sqrt(var + BN_EPS)
    y = y * gamma[None, :, None] + beta[None, :, None]
    if use_relu:
        y = jnp.maximum(y, 0.0)
    return y


if __name__ == "__main__":
    # Small shapes consistent with the module: batch=2, in_channels=4, length=16,
    # out_channels=8, kernel_size=3, stride=1, padding=1, activation=ReLU.
    N, C_IN, L = 2, 4, 16
    C_OUT, K, STRIDE, PAD = 8, 3, 1, 1

    key = jax.random.PRNGKey(0)
    kx, kw, kg, kb = jax.random.split(key, 4)

    x = jax.random.normal(kx, (N, C_IN, L), dtype=jnp.float32)
    weight = jax.random.normal(kw, (C_OUT, C_IN, K), dtype=jnp.float32) * 0.1
    gamma = 1.0 + 0.1 * jax.random.normal(kg, (C_OUT,), dtype=jnp.float32)
    beta = 0.1 * jax.random.normal(kb, (C_OUT,), dtype=jnp.float32)

    out = batchnorm_conv1d(x, weight, gamma, beta,
                           stride=STRIDE, padding=PAD, use_relu=True)
    out = jax.block_until_ready(out)

    ref = _reference(x, weight, gamma, beta,
                     stride=STRIDE, padding=PAD, use_relu=True)

    assert out.shape == (N, C_OUT, (L + 2 * PAD - K) // STRIDE + 1)
    assert jnp.allclose(out, ref, atol=1e-4, rtol=1e-4), (
        f"max abs err {jnp.max(jnp.abs(out - ref))}")

    print("KERNEL_OK")
</pallas_src>

<mosaic_0001>
module attributes {stable_mosaic.version = 11 : i64} {
  func.func @_stats_kernel(%arg0: i32, %arg1: i32, %arg2: memref<1x8x130xf32, #tpu.memory_space<vmem>>, %arg3: memref<8x24xf32, #tpu.memory_space<vmem>>, %arg4: memref<1x2x8xf32, #tpu.memory_space<vmem>>, %arg5: memref<2x8x128xf32, #tpu.memory_space<vmem>>) attributes {dimension_semantics = [#tpu.dimension_semantics<parallel>, #tpu.dimension_semantics<arbitrary>], iteration_bounds = array<i64: 2, 1>, scalar_prefetch = 0 : i64, scratch_operands = 1 : i64, tpu.core_type = #tpu.core_type<tc>, window_params = [{transform_indices = @transform_0, window_bounds = array<i64: 1, 8, 130>}, {pipeline_mode = #tpu.pipeline_mode<synchronous>, transform_indices = @transform_1, window_bounds = array<i64: 8, 24>}, {transform_indices = @transform_2, window_bounds = array<i64: 1, 2, 8>}]} {
    %c0_i32 = arith.constant 0 : i32
    %0 = arith.cmpi eq, %arg1, %c0_i32 : i32
    %1 = arith.extui %0 : i1 to i32
    %c0_i32_0 = arith.constant 0 : i32
    %2 = arith.cmpi ne, %1, %c0_i32_0 : i32
    scf.if %2 {
      %cst_24 = arith.constant 0.000000e+00 : f32
      %36 = vector.broadcast %cst_24 : f32 to vector<2x8x128xf32>
      %c0_25 = arith.constant 0 : index
      %c0_26 = arith.constant 0 : index
      %c0_27 = arith.constant 0 : index
      %37 = vector.load %arg5[%c0_25, %c0_26, %c0_27] : memref<2x8x128xf32, #tpu.memory_space<vmem>>, vector<2x8x128xf32>
      tpu.vector_store %arg5[%c0_25, %c0_26, %c0_27], %36 {strides = array<i32>} : memref<2x8x128xf32, #tpu.memory_space<vmem>>, vector<2x8x128xf32>,
    } else {
    }
    %c0 = arith.constant 0 : index
    %c0_1 = arith.constant 0 : index
    %c0_2 = arith.constant 0 : index
    %3 = vector.load %arg2[%c0, %c0_1, %c0_2] : memref<1x8x130xf32, #tpu.memory_space<vmem>>, vector<1x8x128xf32>
    %4 = vector.shape_cast %3 : vector<1x8x128xf32> to vector<8x128xf32>
    %c0_3 = arith.constant 0 : index
    %c0_4 = arith.constant 0 : index
    %c1 = arith.constant 1 : index
    %5 = vector.load %arg2[%c0_3, %c0_4, %c1] : memref<1x8x130xf32, #tpu.memory_space<vmem>>, vector<1x8x128xf32>
    %6 = vector.shape_cast %5 : vector<1x8x128xf32> to vector<8x128xf32>
    %c0_5 = arith.constant 0 : index
    %c0_6 = arith.constant 0 : index
    %c2 = arith.constant 2 : index
    %7 = vector.load %arg2[%c0_5, %c0_6, %c2] : memref<1x8x130xf32, #tpu.memory_space<vmem>>, vector<1x8x128xf32>
    %8 = vector.shape_cast %7 : vector<1x8x128xf32> to vector<8x128xf32>
    %9 = tpu.concatenate %4, %6, %8 in 0 : vector<8x128xf32>, vector<8x128xf32>, vector<8x128xf32> -> vector<24x128xf32>
    %c0_7 = arith.constant 0 : index
    %c0_8 = arith.constant 0 : index
    %10 = vector.load %arg3[%c0_7, %c0_8] : memref<8x24xf32, #tpu.memory_space<vmem>>, vector<8x24xf32>
    %cst = arith.constant dense<0.000000e+00> : vector<8x128xf32>
    %11 = tpu.matmul %10, %9, %cst {dimension_numbers = #tpu.dot_dimension_numbers<[1], [0], [0], [1], [0, 0, 1, 1], [], []>} : vector<8x24xf32>, vector<24x128xf32>, vector<8x128xf32> -> vector<8x128xf32>
    %12 = tpu.iota {dimensions = array<i32: 1>} : vector<8x128xi32>
    %c128_i32 = arith.constant 128 : i32
    %13 = arith.muli %arg1, %c128_i32 : i32
    %14 = vector.broadcast %13 : i32 to vector<8x128xi32>
    %15 = arith.addi %12, %14 : vector<8x128xi32>
    %c16_i32 = arith.constant 16 : i32
    %16 = vector.broadcast %c16_i32 : i32 to vector<8x128xi32>
    %17 = arith.cmpi slt, %15, %16 : vector<8x128xi32>
    %cst_9 = arith.constant 0.000000e+00 : f32
    %18 = vector.broadcast %cst_9 : f32 to vector<8x128xf32>
    %19 = arith.select %17, %11, %18 : vector<8x128xi1>, vector<8x128xf32>
    %c0_10 = arith.constant 0 : index
    %c0_11 = arith.constant 0 : index
    %c0_12 = arith.constant 0 : index
    %20 = vector.load %arg5[%c0_10, %c0_11, %c0_12] : memref<2x8x128xf32, #tpu.memory_space<vmem>>, vector<1x8x128xf32>
    %21 = vector.shape_cast %20 : vector<1x8x128xf32> to vector<8x128xf32>
    %22 = arith.addf %21, %19 : vector<8x128xf32>
    %c0_13 = arith.constant 0 : index
    %c0_14 = arith.constant 0 : index
    %c0_15 = arith.constant 0 : index
    %23 = vector.load %arg5[%c0_13, %c0_14, %c0_15] : memref<2x8x128xf32, #tpu.memory_space<vmem>>, vector<1x8x128xf32>
    %24 = vector.shape_cast %23 : vector<1x8x128xf32> to vector<8x128xf32>
    %25 = vector.shape_cast %22 : vector<8x128xf32> to vector<1x8x128xf32>
    tpu.vector_store %arg5[%c0_13, %c0_14, %c0_15], %25 {strides = array<i32>} : memref<2x8x128xf32, #tpu.memory_space<vmem>>, vector<1x8x128xf32>,
    %c1_16 = arith.constant 1 : index
    %c0_17 = arith.constant 0 : index
    %c0_18 = arith.constant 0 : index
    %26 = vector.load %arg5[%c1_16, %c0_17, %c0_18] : memref<2x8x128xf32, #tpu.memory_space<vmem>>, vector<1x8x128xf32>
    %27 = vector.shape_cast %26 : vector<1x8x128xf32> to vector<8x128xf32>
    %28 = arith.mulf %19, %19 : vector<8x128xf32>
    %29 = arith.addf %27, %28 : vector<8x128xf32>
    %c1_19 = arith.constant 1 : index
    %c0_20 = arith.constant 0 : index
    %c0_21 = arith.constant 0 : index
    %30 = vector.load %arg5[%c1_19, %c0_20, %c0_21] : memref<2x8x128xf32, #tpu.memory_space<vmem>>, vector<1x8x128xf32>
    %31 = vector.shape_cast %30 : vector<1x8x128xf32> to vector<8x128xf32>
    %32 = vector.shape_cast %29 : vector<8x128xf32> to vector<1x8x128xf32>
    tpu.vector_store %arg5[%c1_19, %c0_20, %c0_21], %32 {strides = array<i32>} : memref<2x8x128xf32, #tpu.memory_space<vmem>>, vector<1x8x128xf32>,
    %c0_i32_22 = arith.constant 0 : i32
    %33 = arith.cmpi eq, %arg1, %c0_i32_22 : i32
    %34 = arith.extui %33 : i1 to i32
    %c0_i32_23 = arith.constant 0 : i32
    %35 = arith.cmpi ne, %34, %c0_i32_23 : i32
    scf.if %35 {
      %c0_24 = arith.constant 0 : index
      %c0_25 = arith.constant 0 : index
      %c0_26 = arith.constant 0 : index
      %36 = vector.load %arg5[%c0_24, %c0_25, %c0_26] : memref<2x8x128xf32, #tpu.memory_space<vmem>>, vector<2x8x128xf32>
      %cst_27 = arith.constant dense<0.000000e+00> : vector<2x8xf32>
      %37 = vector.multi_reduction <add>, %36, %cst_27 [2] : vector<2x8x128xf32> to vector<2x8xf32>
      %38 = vector.shape_cast %37 : vector<2x8xf32> to vector<1x2x8xf32>
      %c0_28 = arith.constant 0 : index
      %c0_29 = arith.constant 0 : index
      %c0_30 = arith.constant 0 : index
      %39 = vector.load %arg4[%c0_28, %c0_29, %c0_30] : memref<1x2x8xf32, #tpu.memory_space<vmem>>, vector<1x2x8xf32>
      tpu.vector_store %arg4[%c0_28, %c0_29, %c0_30], %38 {strides = array<i32>} : memref<1x2x8xf32, #tpu.memory_space<vmem>>, vector<1x2x8xf32>,
    } else {
    }
    return
  }
  func.func @transform_0(%arg0: i32, %arg1: i32) -> (i32, i32, i32) {
    %c0_i32 = arith.constant 0 : i32
    %c0_i32_0 = arith.constant 0 : i32
    %c0_i32_1 = arith.constant 0 : i32
    return %arg0, %c0_i32, %c0_i32_0 : i32, i32, i32
  }
  func.func @transform_1(%arg0: i32, %arg1: i32) -> (i32, i32) {
    %c0_i32 = arith.constant 0 : i32
    %c0_i32_0 = arith.constant 0 : i32
    %c0_i32_1 = arith.constant 0 : i32
    return %c0_i32, %c0_i32_0 : i32, i32
  }
  func.func @transform_2(%arg0: i32, %arg1: i32) -> (i32, i32, i32) {
    %c0_i32 = arith.constant 0 : i32
    %c0_i32_0 = arith.constant 0 : i32
    %c0_i32_1 = arith.constant 0 : i32
    return %arg0, %c0_i32, %c0_i32_0 : i32, i32, i32
  }
}

</mosaic_0001>

<bundles_post_ra>
// kernel: tpu_custom_call.1
= control target key start
LH: loop header
LB: loop body
LE: loop exit
PB: predicated region body
PF: predicated region fallthrough
CT: control target
= control target key end

     0   :  { %7 = vsyncpa [#allocation4], 0  ;;  %s928_s0 = inlined_call_operand.hbm [shape: f32[2,8,130], index: 0, kind: input, shape index: {}]   ;;  %s929_s1 = inlined_call_operand.hbm [shape: f32[8,24], index: 1, kind: input, shape index: {}]   ;;  %s930_s2 = inlined_call_operand.hbm [shape: f32[2,2,8], index: 2, kind: output, shape index: {}]  }
   0x1   :  { %9 = vsyncpa [#allocation4 + $0x1], 0 }
   0x2   :  { %10 = vsyncpa [#allocation7], 0 }
   0x3   :  { %11 = vsyncpa [#allocation5], 0 }
   0x4   :  { %13 = vsyncpa [#allocation5 + $0x1], 0  ;;  %s711_s9 = smov 0   ;;  %s713_s10 = smov 0  }
   0x5   :  { %s715_s11 = smov 0   ;;  %s717_s12 = smov 0  }
   0x6   :  { %s719_s13 = smov 0   ;;  %s721_s14 = smov 0  }
   0x7 LB: > { %s425_s15 = sadd.s32 4294967295, %s686_s14   ;;  %s426_s16 = sadd.s32 4294967294, %s686_s14   ;;  %s686_s14 = sphi %s721_s14, %s19_s14   ;;  %s682_s13 = sphi %s719_s13, %s955_s13   ;;  %s678_s12 = sphi %s717_s12, %s954_s12   ;;  %s674_s11 = sphi %s715_s11, %s953_s11   ;;  %s670_s10 = sphi %s713_s10, %s952_s10   ;;  %s666_s9 = sphi %s711_s9, %s951_s9  }
   0x8   : > { %p51_p0 = scmp.ne.s32.totalorder %s670_s10, %s666_s9  ;;  %p745_p1 = scmp.eq.s32.totalorder %s425_s15, 0 }
   0x9   : > { %p749_p2 = scmp.eq.s32.totalorder %s425_s15, 1  ;;  %p102_p3 = scmp.eq.s32.totalorder %s426_s16, 1 }
   0xa   : > { %s935_s17 = scalar_select %p745_p1, 1, 0 }
   0xb   : > { %s936_s18 = scalar_select %p749_p2, 1, 0 }
   0xc   : > { %p755_p4 = por %p745_p1, %p51_p0  ;;  %p427_p5 = scmp.ge.s32.totalorder %s686_s14, 1 }
   0xd   : > { %p760_p6 = por %p102_p3, %p51_p0  ;;  %p109_p7 = scmp.lt.s32.totalorder %s686_s14, 3 }
   0xe   : > { %s937_s19 = scalar_select %p755_p4, 1, 0 }
   0xf   : > { %s938_s20 = scalar_select %p760_p6, 1, 0 }
  0x10   : > { %p765_p8 = pnand %p427_p5, %p109_p7  ;;  %s688_s22 = smov [#allocation6]  }
  0x11   : > { %s122_s23 = sshll.u32 %s688_s22, 4  ;;  %s31_s25 = sadd.s32 1, %s682_s13  ;;  %s123_s23 = int_to_ptr.vmem [resolvable:$true] %s122_s23 }
  0x12   : > { %s939_s21 = scalar_select %p765_p8, 1, 0 }
  0x13   : > { %p467_p10 = pneg %p765_p8  ;;  %s38_s26 = sadd.s32 1, %s674_s11 }
  0x14   : > { %p780_p12 = scmp.ge.s32.totalorder %s31_s25, 2  ;;  %s542_s30 = scalar_lea.hbm %s929_s1, 128 }
  0x15   : > { %p774_p11 = pnand %p467_p10, %p745_p1  ;;  %p543_p13 = scmp.ne.s32.totalorder %s929_s1, %s542_s30 }
  0x16   : > { %s941_s27 = scalar_select %p780_p12, 1, 0 }
  0x17   : > { %p544_p0 = pneg %p774_p11  ;;  %p549_p7 = scmp.lt.u32.totalorder %s542_s30, %s929_s1 }
  0x19   : > { %p545_p3 = pnand %p544_p0, %p543_p13 }
  0x1b   : > { %p546_p5 = pneg %p545_p3 }
  0x1d   : > { %p551_p10 = pnand %p549_p7, %p546_p5 }
  0x1f   : > { %554 = shalt.err (!%p551_p10)
}
  0x20   : > { %s555_s7 = scalar_lea.vmem %s123_s23, 128  ;;  %p563_p4 = scmp.lt.s32.totalorder %s123_s23, %s123_s23 }
  0x21   : > { %p556_p9 = scmp.ne.s32.totalorder %s123_s23, %s555_s7  ;;  %p564_p8 = scmp.lt.s32.totalorder %s555_s7, %s555_s7 }
  0x23   : > { %p558_p6 = pnand %p556_p9, %p544_p0  ;;  %p565_p2 = por %p564_p8, %p563_p4 }
  0x25   : > { %p559_p1 = pneg %p558_p6 }
  0x27   : > { %p566_p12 = pnand %p565_p2, %p559_p1 }
  0x29   : > { %569 = shalt.err (!%p566_p12)
}
  0x2a   : > { %470 = dma.hbm_to_vmem [thread:$0]  (!%p774_p11), %s929_s1, 128, %s123_s23, [#allocation7]  }
  0x2b   : > { %p942_p4 = scmp.ne.s32.totalorder %s941_s27, 0  ;;  %p45_p1 = scmp.ne.s32.totalorder %s674_s11, %s670_s10 }
  0x2c   : > { %p46_p2 = scmp.eq.s32.totalorder %s686_s14, 0  ;;  %p480_p6 = scmp.lt.s32.totalorder %s686_s14, 2 }
  0x2d   : > { %s957_s25 = smov (%p942_p4, %s31_s25), 0  ;;  %p943_p12 = scmp.ne.s32.totalorder %s936_s18, 0 }
  0x2e   : > { %s35_s16 = ssub.s32 %s682_s13, %s957_s25  ;;  %p47_p9 = por %p46_p2, %p45_p1 }
  0x2f   : > { %p36_p8 = scmp.eq.s32.totalorder %s35_s16, 0  ;;  %p812_p13 = por %p943_p12, %p45_p1 }
  0x30   : > { %s133_s24 = sand.u32 1, %s674_s11   ;;  %s442_s27 = sshll.u32 %s682_s13, 8 }
  0x31   : > { %s820_s28 = scalar_select %p36_p8, %s674_s11, %s38_s26  }
  0x32   : > { %s430_s23 = sshll.u32 %s133_s24, 4  ;;  %s826_s3 = scalar_lea.hbm %s928_s0, %s442_s27 }
  0x33   : > { %s137_s18 = scalar_lea.vmem [#allocation3], %s430_s23  ;;  %p830_p11 = pnand %p480_p6, %p47_p9 }
  0x34   : > { %s145_s4 = sshll.u32 %s137_s18, 4  ;;  %s134_s26 = scalar_lea.sflag [#allocation4], %s133_s24  ;;  %s828_s4 = int_to_ptr.vmem [resolvable:$true] %s145_s4 }
  0x35   : > { %s570_s6 = scalar_lea.hbm %s826_s3, 256  ;;  %p572_p3 = pneg %p830_p11 }
  0x36   : > { %p571_p0 = scmp.ne.s32.totalorder %s826_s3, %s570_s6  ;;  %s575_s15 = scalar_lea.hbm %s928_s0, 512 }
  0x37   : > { %p576_p10 = scmp.lt.u32.totalorder %s826_s3, %s928_s0  ;;  %p577_p4 = scmp.lt.u32.totalorder %s575_s15, %s570_s6 }
  0x38   : > { %p573_p5 = pnand %p572_p3, %p571_p0  ;;  %p579_p2 = scmp.lt.u32.totalorder %s570_s6, %s826_s3 }
  0x39   : > { %p578_p1 = por %p577_p4, %p576_p10 }
  0x3a   : > { %p574_p7 = pneg %p573_p5 }
  0x3b   : > { %p580_p6 = por %p579_p2, %p578_p1 }
  0x3d   : > { %p581_p8 = pnand %p580_p6, %p574_p7 }
  0x3f   : > { %584 = shalt.err (!%p581_p8)
}
  0x40   : > { %s585_s24 = scalar_lea.vmem %s828_s4, 256  ;;  %s689_s27 = smov [#allocation3]  }
  0x41   : > { %p586_p9 = scmp.ne.s32.totalorder %s828_s4, %s585_s24  ;;  %s590_s29 = sshll.u32 %s689_s27, 4  ;;  %s591_s29 = int_to_ptr.vmem [resolvable:$false] %s590_s29 }
  0x42   : > { %s592_s30 = scalar_lea.vmem %s591_s29, 512  ;;  %p593_p5 = scmp.lt.s32.totalorder %s828_s4, %s591_s29 }
  0x43   : > { %p588_p12 = pnand %p586_p9, %p572_p3  ;;  %p594_p10 = scmp.lt.s32.totalorder %s592_s30, %s585_s24 }
  0x45   : > { %p589_p0 = pneg %p588_p12  ;;  %p595_p4 = por %p594_p10, %p593_p5 }
  0x47   : > { %p596_p1 = pnand %p595_p4, %p589_p0 }
  0x49   : > { %599 = shalt.err (!%p596_p1)
}
  0x4a   : > { %474 = dma.hbm_to_vmem [thread:$0]  (!%p830_p11), %s826_s3, 256, %s828_s4, %s134_s26  }
  0x4b   : > { %p946_p7 = scmp.ne.s32.totalorder %s939_s21, 0 }
  0x4c   : > { %s862_s18 = sand.u32 (!%p946_p7), 1, %s670_s10   ;;  %p947_p3 = scmp.ne.s32.totalorder (!%p946_p7), %s937_s19, 0 }
  0x4d   : > { %154 = sbr.rel (%p946_p7) target bundleno = 591 (0x24f), region = 28  ;;  %s434_s6 = sshll.u32 (!%p946_p7), %s862_s18, 4 }
  0x4e   : > { %s157_s7 = scalar_lea.sflag (!%p946_p7), [#allocation4], %s862_s18  ;;  %s160_s8 = scalar_lea.vmem (!%p946_p7), [#allocation3], %s434_s6 }
  0x54   : > { %653 = dma.done.wait (%p947_p3), %s157_s7, 256  }
  0x55   : > { %655 = vsyncadd (%p947_p3), %s157_s7, 4294967040  ;;  %p948_p2 = scmp.ne.s32.totalorder %s935_s17, 0 }
  0x57   : > { %657 = dma.done.wait (%p948_p2), [#allocation7], 128  }
  0x58   : > { %659 = vsyncadd (%p948_p2), [#allocation7], 4294967168  ;;  %v690_v0 = vmov 0.0|0.0   ;;  %vm691_vm0 = vmmov 0   ;;  %v692_v1 = vmov 0.0   ;;  %v191_v2 = vld [vmem:[%s160_s8] sm:$0xff]  ;;  %v284_v14 = vlaneseq }
  0x59   : > { %456 = vmatprep.subr.bf16.mxu0 %v690_v0  ;;  %453 = vmatprep.mubr.msk.f32.mxu0 %vm691_vm0, %v692_v1  ;;  %v192_v3 = vld [vmem:[%s160_s8 + $0x8] sm:$0xff]  ;;  %s693_s21 = smov 126   ;;  %s694_s3 = smov 127   ;;  %vm199_vm1 = vcmask 1039360   ;;  %vm206_vm2 = vcmask 1031168   ;;  %v209_v13 = vld [vmem:[#allocation6] sm:$0xff] }
  0x5a   : > { %v537_v4 = vpack.i.bf16 %v192_v3, %v191_v2  ;;  %204 = vrot.lane.b32.xlu1 %v192_v3, %s693_s21  ;;  %vm210_vm3 = vcmask 195584   ;;  %v285_v15 = vand.u32 127, %v284_v14  ;;  %v311_v16 = vshrl.u32 %v284_v14, 7  ;;  %s436_s17 = sshll.u32 %s862_s18, 1  ;;  %s439_s19 = sshll.u32 %s678_s12, 5 }
  0x5b   : > { %s184_s4 = scalar_lea.vmem [#allocation8], %s436_s17  ;;  %vm318_vm5 = vcmask 1041409   ;;  %vm321_vm6 = vcmask 58368   ;;  %s879_s16 = scalar_lea.hbm %s930_s2, %s439_s19 }
  0x5c   : > { %538 = vrot.lane.b32.xlu0 %v537_v4, %s694_s3  ;;  %v312_v17 = vsub.s32 %v285_v15, %v311_v16  ;;  %vm289_vm4 = vcmp.lt.s32.totalorder %v285_v15, 16  ;;  %s337_s5 = sshll.u32 %s184_s4, 4  ;;  %s324_s12 = scalar_lea.sflag [#allocation5], %s862_s18  ;;  %s881_s5 = int_to_ptr.vmem [resolvable:$true] %s337_s5 }
  0x5d   : > { %s600_s23 = scalar_lea.vmem %s881_s5, 32  ;;  %s695_s24 = smov [#allocation8]  }
  0x5e   : > { %p601_p11 = scmp.ne.s32.totalorder %s881_s5, %s600_s23  ;;  %s604_s27 = sshll.u32 %s695_s24, 4  ;;  %s605_s27 = int_to_ptr.vmem [resolvable:$false] %s604_s27 }
  0x5f   : > { %s606_s29 = scalar_lea.vmem %s605_s27, 64  ;;  %p607_p9 = scmp.lt.s32.totalorder %s881_s5, %s605_s27 }
  0x60   : > { %202 = vrot.lane.b32.xlu0 %v191_v2, %s693_s21  ;;  %p602_p6 = pnand %p601_p11, %p812_p13  ;;  %p608_p12 = scmp.lt.s32.totalorder %s606_s29, %s600_s23 }
  0x62   : > { %p603_p8 = pneg %p602_p6  ;;  %p609_p0 = por %p608_p12, %p607_p9 }
  0x64   : > { %p610_p5 = pnand %p609_p0, %p603_p8 }
  0xcc   : > { %v205_v10 = vpop.permute.xlu1 %204 }
  0xce   : > { %v539_v5 = vpop.permute.xlu0 %538 }
  0xcf   : > { %v541_v6 = vunpack.i.h.bf16 %v539_v5  ;;  %v540_v7 = vunpack.i.l.bf16 %v539_v5 }
  0xd1   : > { %v200_v8 = vsel %vm199_vm1, %v540_v7, %v541_v6 }
  0xd2   : > { %v457_v9 = vpack.c.bf16 %v200_v8, %v191_v2  ;;  %v203_v11 = vpop.permute.xlu0 %202 }
  0xd3   : > { %v207_v12 = vsel %vm206_vm2, %v203_v11, %v205_v10 }
  0xd4   : > { %458 = vmatpush3.bf16.msra.mxu0 %v457_v9 }
  0xd5   : > { %451 = vmatprep.subr.mxu0 %v692_v1 }
  0xd8   : > { %452 = vmatpush3.msra.mxu0 %v207_v12 }
  0xd9   : > { %454 = vmatmul.mubr.msk.f32.vlgmr.msra.gmra.mrb[0].mxu0 %vm210_vm3, %v209_v13 }
 0x1ac   : > { %v280_v18 = vpop.f32.mrb[0].mxu0 }
 0x1ad   : > { %v455_v19 = vpop.f32.mrb[1].mxu0  ;;  %v290_v20 = vsel %vm289_vm4, %v280_v18, 0.0 }
 0x1ae   : > { %304 = vadd.xlane.f32.xlu1 %v290_v20  ;;  %v296_v21 = vmul.f32 %v290_v20, %v290_v20 }
 0x1b0   : > { %306 = vadd.xlane.f32.xlu0 %v296_v21 }
 0x23b   : > { %v305_v22 = vpop.xlane.xlu1 %304 }
 0x23c   : > { %v313_v24 = vrot.slane %v305_v22, %v312_v17 }
 0x23d   : > { %v307_v23 = vpop.xlane.xlu0 %306 }
 0x23e   : > { %v317_v25 = vrot.slane %v307_v23, %v312_v17 }
 0x240   : > { %v319_v26 = vsel %vm318_vm5, %v317_v25, %v313_v24 }
 0x241   : > { %322 = vst.msk [vmem:[%s184_s4] sm:$0x3] %vm321_vm6, %v319_v26 }
 0x242   : > { %613 = shalt.err (!%p610_p5)
}
 0x243   : > { %s614_s30 = scalar_lea.hbm %s879_s16, 32  ;;  %s618_s7 = scalar_lea.hbm %s930_s2, 64 }
 0x244   : > { %p615_p10 = scmp.ne.s32.totalorder %s879_s16, %s614_s30  ;;  %p619_p7 = scmp.lt.u32.totalorder %s879_s16, %s930_s2 }
 0x245   : > { %p620_p3 = scmp.lt.u32.totalorder %s618_s7, %s614_s30  ;;  %p622_p11 = scmp.lt.u32.totalorder %s614_s30, %s879_s16 }
 0x246   : > { %p616_p4 = pnand %p615_p10, %p812_p13 }
 0x247   : > { %p621_p2 = por %p620_p3, %p619_p7 }
 0x248   : > { %p617_p1 = pneg %p616_p4 }
 0x249   : > { %p623_p6 = por %p622_p11, %p621_p2 }
 0x24b   : > { %p624_p8 = pnand %p623_p6, %p617_p1 }
 0x24d   : > { %627 = shalt.err (!%p624_p8)
}
 0x24e   : > { %465 = dma.vmem_to_hbm [thread:$0]  (%p812_p13), %s881_s5, 32, %s879_s16, %s324_s12  }
 0x24f PF: > { %s349_s3 = sand.u32 1, %s666_s9   ;;  %p949_p9 = scmp.ne.s32.totalorder %s938_s20, 0 }
 0x250   : > { %p950_p12 = scmp.ge.s32.totalorder %s686_s14, 2  ;;  %s350_s17 = scalar_lea.sflag [#allocation5], %s349_s3 }
 0x252   : > { %p476_p0 = pnand %p950_p12, %p949_p9 }
 0x254   : > { %661 = dma.done.wait (!%p476_p0), %s350_s17, 32  }
 0x255   : > { %663 = vsyncadd (!%p476_p0), %s350_s17, 4294967264  ;;  %s19_s14 = sadd.s32 1, %s686_s14   ;;  %s951_s9 = smov %s670_s10 }
 0x256   : > { %p16_p5 = scmp.ge.s32.totalorder %s19_s14, 4   ;;  %s952_s10 = smov %s674_s11 }
 0x257   : > { %s953_s11 = smov %s820_s28  ;;  %s954_s12 = smov %s682_s13 }
 0x258   : > { %s955_s13 = smov %s957_s25  ;;  %18 = sbr.rel (!%p16_p5) target bundleno = 7 (0x7), region = 86 }
 0x25f   :  { %355 = vsyncpa [#allocation4], 1 }
 0x260   :  { %357 = vsyncpa [#allocation4 + $0x1], 1 }
 0x261   :  { %358 = vsyncpa [#allocation7], 1 }
 0x262   :  { %359 = vsyncpa [#allocation5], 1 }
 0x263   :  { %361 = vsyncpa [#allocation5 + $0x1], 1 }

</bundles_post_ra>
